<compile_context>
chip_gen: v5e
topology: v5e:2x2
jax: 0.10.0
libtpu: 0.0.40
codegen_flags: <defaults>
</compile_context>

<pallas_src>
import functools

import numpy as np

import jax
import jax.numpy as jnp
from jax.experimental import pallas as pl
from jax.experimental.pallas import tpu as pltpu


_VMEM_LIMIT_BYTES = 64 * 1024 * 1024   # explicit scoped-VMEM budget (v5e/v6e/v7x safe)


def _round_up(x, m):
    return ((x + m - 1) // m) * m


def _pick_tile(total, candidates):
    for c in candidates:
        if c <= total and total % c == 0:
            return c
    return total


# ----------------------------------------------------------------------------
# Kernel 1: fused node kernel.
#   e1 = relu(x @ W1 + b1)                      (stays in VMEM)
#   p  = e1 @ [w_e1i|w_e1j] + e2 @ [w_e2i|w_e2j] + [b2, 0]   -> [TN, 2]
# col 0 = source-side projection (edge bias folded in), col 1 = dest-side.
# ----------------------------------------------------------------------------
def _node_proj_kernel(x_ref, e2_ref, w1_ref, b1_ref, wp1_ref, wp2_ref, pb_ref,
                      p_ref):
    e1 = jnp.dot(x_ref[...], w1_ref[...], preferred_element_type=jnp.float32)
    e1 = jnp.maximum(e1 + b1_ref[...], 0.0)
    p = (jnp.dot(e1, wp1_ref[...], preferred_element_type=jnp.float32)
         + jnp.dot(e2_ref[...], wp2_ref[...], preferred_element_type=jnp.float32)
         + pb_ref[...])
    p_ref[...] = p.astype(p_ref.dtype)


def node_projections_pallas(feats, e2, w1, b1, wp_e1, wp_e2, p_bias):
    n, f = feats.shape
    d2 = e2.shape[1]
    e1_dim = w1.shape[1]
    n_pad = _round_up(n, 128)                  # lane-aligned node count for kernel 2
    tn = _pick_tile(n_pad, (512, 256, 128))    # node-row tile (double-buffered)
    feats_p = jnp.pad(feats, ((0, n_pad - n), (0, 0)))
    e2_p = jnp.pad(e2, ((0, n_pad - n), (0, 0)))
    return pl.pallas_call(
        _node_proj_kernel,
        out_shape=jax.ShapeDtypeStruct((n_pad, 2), jnp.float32),
        grid=(n_pad // tn,),
        in_specs=[
            pl.BlockSpec((tn, f), lambda i: (i, 0)),       # feats tile
            pl.BlockSpec((tn, d2), lambda i: (i, 0)),      # e2 tile
            pl.BlockSpec((f, e1_dim), lambda i: (0, 0)),   # W1 (resident)
            pl.BlockSpec((1, e1_dim), lambda i: (0, 0)),   # b1
            pl.BlockSpec((e1_dim, 2), lambda i: (0, 0)),   # [w_e1i | w_e1j]
            pl.BlockSpec((d2, 2), lambda i: (0, 0)),       # [w_e2i | w_e2j]
            pl.BlockSpec((1, 2), lambda i: (0, 0)),        # [b2, 0]
        ],
        out_specs=pl.BlockSpec((tn, 2), lambda i: (i, 0)),
        compiler_params=pltpu.CompilerParams(
            dimension_semantics=("parallel",),
            vmem_limit_bytes=_VMEM_LIMIT_BYTES),
    )(feats_p, e2_p, w1, b1.reshape(1, e1_dim), wp_e1, wp_e2, p_bias)


# ----------------------------------------------------------------------------
# Kernel 2: per-edge score = p_src[src[e]] + p_dst[dst[e]]   (bias pre-folded)
# Edges on lanes (TE per tile, lane-dense output); node dim tiled as a
# reduction axis (grid axis 1, "arbitrary"), accumulated directly in o_ref.
# ----------------------------------------------------------------------------
def _edge_score_kernel(src_ref, dst_ref, ps_ref, pd_ref, o_ref, *, tnk, te):
    k = pl.program_id(1)

    @pl.when(k == 0)
    def _init():
        o_ref[...] = jnp.zeros_like(o_ref)

    src = src_ref[...]                                           # [1, TE] int32
    dst = dst_ref[...]
    node_ids = k * tnk + jax.lax.broadcasted_iota(jnp.int32, (tnk, te), 0)
    s_oh = (node_ids == src).astype(jnp.float32)                 # [TNK, TE]
    d_oh = (node_ids == dst).astype(jnp.float32)
    o_ref[...] += (
        jnp.dot(ps_ref[...], s_oh, preferred_element_type=jnp.float32)
        + jnp.dot(pd_ref[...], d_oh, preferred_element_type=jnp.float32))


def edge_score_pallas(src, dst, p_nodes, *, te=256):
    e_num = int(src.shape[0])
    n_pad = p_nodes.shape[0]
    # Lane-dense per-node projection rows (wrapper-side layout plumbing).
    ps = p_nodes[:, 0].reshape(1, n_pad)
    pd = p_nodes[:, 1].reshape(1, n_pad)
    e_pad = _round_up(max(e_num, 1), te)
    pad = e_pad - e_num
    src_p = jnp.pad(src.astype(jnp.int32), (0, pad)).reshape(1, e_pad)
    dst_p = jnp.pad(dst.astype(jnp.int32), (0, pad)).reshape(1, e_pad)
    tnk = _pick_tile(n_pad, (2048, 1024, 512, 256, 128))
    kernel = functools.partial(_edge_score_kernel, tnk=tnk, te=te)
    out = pl.pallas_call(
        kernel,
        out_shape=jax.ShapeDtypeStruct((1, e_pad), jnp.float32),
        grid=(e_pad // te, n_pad // tnk),
        in_specs=[
            pl.BlockSpec((1, te), lambda i, k: (0, i)),    # src ids (lane-dense)
            pl.BlockSpec((1, te), lambda i, k: (0, i)),    # dst ids (lane-dense)
            pl.BlockSpec((1, tnk), lambda i, k: (0, k)),   # p_src slice
            pl.BlockSpec((1, tnk), lambda i, k: (0, k)),   # p_dst slice
        ],
        out_specs=pl.BlockSpec((1, te), lambda i, k: (0, i)),
        compiler_params=pltpu.CompilerParams(
            dimension_semantics=("parallel", "arbitrary"),
            vmem_limit_bytes=_VMEM_LIMIT_BYTES),
    )(src_p, dst_p, ps, pd)
    return out.reshape(e_pad, 1)[:e_num]


# ----------------------------------------------------------------------------
# Module: p_gs_e1_e2
# ----------------------------------------------------------------------------
class PGsE1E2:
    def __init__(self, n_feat, e1_dim, e2_dim, pos_edge_num, neg_ratio, key):
        self.n_feat = n_feat
        self.e1_dim = e1_dim
        self.e2_dim = e2_dim
        self.pos_edge_num = pos_edge_num
        self.neg_ratio = neg_ratio

        k1, k2, k3, k4 = jax.random.split(key, 4)
        # mlp_e1: Linear(n_feat -> e1_dim), stored as [in, out]
        lim1 = 1.0 / np.sqrt(n_feat)
        self.w1 = jax.random.uniform(k1, (n_feat, e1_dim), jnp.float32, -lim1, lim1)
        self.b1 = jax.random.uniform(k2, (e1_dim,), jnp.float32, -lim1, lim1)
        # p_e1_e2: Linear(2*(e1_dim + 2*e2_dim) -> 1), stored as [in, 1]
        d_total = 2 * (e1_dim + 2 * e2_dim)
        lim2 = 1.0 / np.sqrt(d_total)
        self.w2 = jax.random.uniform(k3, (d_total, 1), jnp.float32, -lim2, lim2)
        self.b2 = jax.random.uniform(k4, (1,), jnp.float32, -lim2, lim2)
        # Split W2 rows matching the concat order [e1_i, e1_j, e2_i, e2_j]
        # and pack them as per-node projection weights.
        d1, d2 = e1_dim, 2 * e2_dim
        w_e1i = self.w2[:d1]
        w_e1j = self.w2[d1:2 * d1]
        w_e2i = self.w2[2 * d1:2 * d1 + d2]
        w_e2j = self.w2[2 * d1 + d2:]
        self.wp_e1 = jnp.concatenate([w_e1i, w_e1j], axis=1)      # [e1_dim, 2]
        self.wp_e2 = jnp.concatenate([w_e2i, w_e2j], axis=1)      # [2*e2_dim, 2]
        # Edge bias folded into the source-side projection (exact by linearity).
        self.p_bias = jnp.concatenate(
            [self.b2.reshape(1, 1), jnp.zeros((1, 1), jnp.float32)], axis=1)

    def __call__(self, feats, e2_c, e2_d, comm_adjs, diff_adjs, key):
        # --- adjacency accumulation & positive-edge selection (glue) ---------
        # TODO(synk): nonzero / subsampling is data-dependent host glue; kept
        # outside the Pallas kernels (non-jittable by nature).
        adj = comm_adjs[0]
        for a in comm_adjs[1:]:
            adj = adj + a
        for a in diff_adjs:
            adj = adj + a
        rows, cols = jnp.nonzero(adj)
        edge_index = jnp.stack([rows, cols]).astype(jnp.int32)
        edge_num = edge_index.shape[1]
        k_perm, k_neg = jax.random.split(key)
        if edge_num > self.pos_edge_num:
            perm = jax.random.permutation(k_perm, edge_num)
            edge_index = edge_index[:, perm[: self.pos_edge_num]]

        # per-node e2 = [e2_c | e2_d]  (== torch.stack(dim=1).view(-1, 2*e2_dim))
        e2 = jnp.concatenate([e2_c, e2_d], axis=1)

        # --- fused node kernel: e1 -> per-node scalar projections (Pallas) ---
        p_nodes = node_projections_pallas(
            feats, e2, self.w1, self.b1, self.wp_e1, self.wp_e2, self.p_bias)

        # --- positive edge scores (Pallas gather+add kernel) ------------------
        e_pred_pos = edge_score_pallas(edge_index[0], edge_index[1], p_nodes)

        # --- negative sampling -------------------------------------------------
        e_pred_neg = None
        edge_index_neg = None
        if self.neg_ratio > 0:
            num_edges_neg = int(self.neg_ratio * edge_index.shape[1])
            edge_index_neg = jax.random.randint(
                k_neg, (2, num_edges_neg), 0, feats.shape[0], dtype=jnp.int32)
            e_pred_neg = edge_score_pallas(
                edge_index_neg[0], edge_index_neg[1], p_nodes)
        return e_pred_pos, e_pred_neg, edge_index, edge_index_neg


# ----------------------------------------------------------------------------
# Pure-JAX reference (mirrors the PyTorch forward) used for verification.
# ----------------------------------------------------------------------------
def ref_edge_scores(edge_index, e1, e2, w2, b2):
    e1_i = e1[edge_index[0]]
    e1_j = e1[edge_index[1]]
    e2_i = e2[edge_index[0]]
    e2_j = e2[edge_index[1]]
    b_ij = jnp.concatenate([e1_i, e1_j, e2_i, e2_j], axis=1)
    return b_ij @ w2 + b2


if __name__ == "__main__":
    key = jax.random.PRNGKey(0)
    k_mod, k_feat, k_e2c, k_e2d, k_a1, k_a2, k_d1, k_fwd = jax.random.split(key, 8)

    # Small shapes consistent with the module.
    N = 16
    n_feat = 16
    e1_dim = 8
    e2_dim = 4
    pos_edge_num = 32
    neg_ratio = 1.0

    model = PGsE1E2(n_feat, e1_dim, e2_dim, pos_edge_num, neg_ratio, k_mod)

    feats = jax.random.normal(k_feat, (N, n_feat), jnp.float32)
    e2_c = jax.random.normal(k_e2c, (N, e2_dim), jnp.float32)
    e2_d = jax.random.normal(k_e2d, (N, e2_dim), jnp.float32)
    comm_adjs = [
        (jax.random.uniform(k_a1, (N, N)) < 0.2).astype(jnp.float32),
        (jax.random.uniform(k_a2, (N, N)) < 0.2).astype(jnp.float32),
    ]
    diff_adjs = [
        (jax.random.uniform(k_d1, (N, N)) < 0.2).astype(jnp.float32),
    ]

    (e_pred_pos, e_pred_neg,
     edge_index, edge_index_neg) = model(feats, e2_c, e2_d,
                                         comm_adjs, diff_adjs, k_fwd)
    jax.block_until_ready(e_pred_pos)
    if e_pred_neg is not None:
        jax.block_until_ready(e_pred_neg)

    # Verify against a plain-JAX reference of the same forward math.
    e1_ref = jnp.maximum(feats @ model.w1 + model.b1, 0.0)
    e2_ref = jnp.concatenate([e2_c, e2_d], axis=1)
    ref_pos = ref_edge_scores(edge_index, e1_ref, e2_ref, model.w2, model.b2)
    assert np.allclose(np.asarray(e_pred_pos), np.asarray(ref_pos),
                       atol=1e-4, rtol=1e-4), "positive edge scores mismatch"
    if e_pred_neg is not None:
        ref_neg = ref_edge_scores(edge_index_neg, e1_ref, e2_ref,
                                  model.w2, model.b2)
        assert np.allclose(np.asarray(e_pred_neg), np.asarray(ref_neg),
                           atol=1e-4, rtol=1e-4), "negative edge scores mismatch"

    assert e_pred_pos.shape == (edge_index.shape[1], 1)
    assert e_pred_neg.shape == (edge_index_neg.shape[1], 1)
    print("KERNEL_OK")
</pallas_src>

<mosaic_0001>
module attributes {stable_mosaic.version = 11 : i64} {
  func.func @_node_proj_kernel(%arg0: i32, %arg1: memref<128x16xf32, #tpu.memory_space<vmem>>, %arg2: memref<128x8xf32, #tpu.memory_space<vmem>>, %arg3: memref<16x8xf32, #tpu.memory_space<vmem>>, %arg4: memref<1x8xf32, #tpu.memory_space<vmem>>, %arg5: memref<8x2xf32, #tpu.memory_space<vmem>>, %arg6: memref<8x2xf32, #tpu.memory_space<vmem>>, %arg7: memref<1x2xf32, #tpu.memory_space<vmem>>, %arg8: memref<128x2xf32, #tpu.memory_space<vmem>>) attributes {dimension_semantics = [#tpu.dimension_semantics<parallel>], iteration_bounds = array<i64: 1>, scalar_prefetch = 0 : i64, scratch_operands = 0 : i64, tpu.core_type = #tpu.core_type<tc>, window_params = [{transform_indices = @transform_0, window_bounds = array<i64: 128, 16>}, {transform_indices = @transform_1, window_bounds = array<i64: 128, 8>}, {pipeline_mode = #tpu.pipeline_mode<synchronous>, transform_indices = @transform_2, window_bounds = array<i64: 16, 8>}, {pipeline_mode = #tpu.pipeline_mode<synchronous>, transform_indices = @transform_3, window_bounds = array<i64: 1, 8>}, {pipeline_mode = #tpu.pipeline_mode<synchronous>, transform_indices = @transform_4, window_bounds = array<i64: 8, 2>}, {pipeline_mode = #tpu.pipeline_mode<synchronous>, transform_indices = @transform_5, window_bounds = array<i64: 8, 2>}, {pipeline_mode = #tpu.pipeline_mode<synchronous>, transform_indices = @transform_6, window_bounds = array<i64: 1, 2>}, {transform_indices = @transform_7, window_bounds = array<i64: 128, 2>}]} {
    %c0 = arith.constant 0 : index
    %c0_0 = arith.constant 0 : index
    %0 = vector.load %arg1[%c0, %c0_0] : memref<128x16xf32, #tpu.memory_space<vmem>>, vector<128x16xf32>
    %c0_1 = arith.constant 0 : index
    %c0_2 = arith.constant 0 : index
    %1 = vector.load %arg3[%c0_1, %c0_2] : memref<16x8xf32, #tpu.memory_space<vmem>>, vector<16x8xf32>
    %cst = arith.constant dense<0.000000e+00> : vector<128x8xf32>
    %2 = tpu.matmul %0, %1, %cst {dimension_numbers = #tpu.dot_dimension_numbers<[1], [0], [0], [1], [0, 0, 1, 1], [], []>} : vector<128x16xf32>, vector<16x8xf32>, vector<128x8xf32> -> vector<128x8xf32>
    %c0_3 = arith.constant 0 : index
    %c0_4 = arith.constant 0 : index
    %3 = vector.load %arg4[%c0_3, %c0_4] : memref<1x8xf32, #tpu.memory_space<vmem>>, vector<1x8xf32>
    %4 = vector.broadcast %3 : vector<1x8xf32> to vector<128x8xf32>
    %5 = arith.addf %2, %4 : vector<128x8xf32>
    %cst_5 = arith.constant 0.000000e+00 : f32
    %6 = vector.broadcast %cst_5 : f32 to vector<128x8xf32>
    %7 = arith.maximumf %5, %6 : vector<128x8xf32>
    %c0_6 = arith.constant 0 : index
    %c0_7 = arith.constant 0 : index
    %8 = vector.load %arg5[%c0_6, %c0_7] : memref<8x2xf32, #tpu.memory_space<vmem>>, vector<8x2xf32>
    %cst_8 = arith.constant dense<0.000000e+00> : vector<128x2xf32>
    %9 = tpu.matmul %7, %8, %cst_8 {dimension_numbers = #tpu.dot_dimension_numbers<[1], [0], [0], [1], [0, 0, 1, 1], [], []>} : vector<128x8xf32>, vector<8x2xf32>, vector<128x2xf32> -> vector<128x2xf32>
    %c0_9 = arith.constant 0 : index
    %c0_10 = arith.constant 0 : index
    %10 = vector.load %arg2[%c0_9, %c0_10] : memref<128x8xf32, #tpu.memory_space<vmem>>, vector<128x8xf32>
    %c0_11 = arith.constant 0 : index
    %c0_12 = arith.constant 0 : index
    %11 = vector.load %arg6[%c0_11, %c0_12] : memref<8x2xf32, #tpu.memory_space<vmem>>, vector<8x2xf32>
    %cst_13 = arith.constant dense<0.000000e+00> : vector<128x2xf32>
    %12 = tpu.matmul %10, %11, %cst_13 {dimension_numbers = #tpu.dot_dimension_numbers<[1], [0], [0], [1], [0, 0, 1, 1], [], []>} : vector<128x8xf32>, vector<8x2xf32>, vector<128x2xf32> -> vector<128x2xf32>
    %13 = arith.addf %9, %12 : vector<128x2xf32>
    %c0_14 = arith.constant 0 : index
    %c0_15 = arith.constant 0 : index
    %14 = vector.load %arg7[%c0_14, %c0_15] : memref<1x2xf32, #tpu.memory_space<vmem>>, vector<1x2xf32>
    %15 = vector.broadcast %14 : vector<1x2xf32> to vector<128x2xf32>
    %16 = arith.addf %13, %15 : vector<128x2xf32>
    %c0_16 = arith.constant 0 : index
    %c0_17 = arith.constant 0 : index
    %17 = vector.load %arg8[%c0_16, %c0_17] : memref<128x2xf32, #tpu.memory_space<vmem>>, vector<128x2xf32>
    tpu.vector_store %arg8[%c0_16, %c0_17], %16 {strides = array<i32>} : memref<128x2xf32, #tpu.memory_space<vmem>>, vector<128x2xf32>,
    return
  }
  func.func @transform_0(%arg0: i32) -> (i32, i32) {
    %c0_i32 = arith.constant 0 : i32
    %c0_i32_0 = arith.constant 0 : i32
    return %arg0, %c0_i32 : i32, i32
  }
  func.func @transform_1(%arg0: i32) -> (i32, i32) {
    %c0_i32 = arith.constant 0 : i32
    %c0_i32_0 = arith.constant 0 : i32
    return %arg0, %c0_i32 : i32, i32
  }
  func.func @transform_2(%arg0: i32) -> (i32, i32) {
    %c0_i32 = arith.constant 0 : i32
    %c0_i32_0 = arith.constant 0 : i32
    %c0_i32_1 = arith.constant 0 : i32
    return %c0_i32, %c0_i32_0 : i32, i32
  }
  func.func @transform_3(%arg0: i32) -> (i32, i32) {
    %c0_i32 = arith.constant 0 : i32
    %c0_i32_0 = arith.constant 0 : i32
    %c0_i32_1 = arith.constant 0 : i32
    return %c0_i32, %c0_i32_0 : i32, i32
  }
  func.func @transform_4(%arg0: i32) -> (i32, i32) {
    %c0_i32 = arith.constant 0 : i32
    %c0_i32_0 = arith.constant 0 : i32
    %c0_i32_1 = arith.constant 0 : i32
    return %c0_i32, %c0_i32_0 : i32, i32
  }
  func.func @transform_5(%arg0: i32) -> (i32, i32) {
    %c0_i32 = arith.constant 0 : i32
    %c0_i32_0 = arith.constant 0 : i32
    %c0_i32_1 = arith.constant 0 : i32
    return %c0_i32, %c0_i32_0 : i32, i32
  }
  func.func @transform_6(%arg0: i32) -> (i32, i32) {
    %c0_i32 = arith.constant 0 : i32
    %c0_i32_0 = arith.constant 0 : i32
    %c0_i32_1 = arith.constant 0 : i32
    return %c0_i32, %c0_i32_0 : i32, i32
  }
  func.func @transform_7(%arg0: i32) -> (i32, i32) {
    %c0_i32 = arith.constant 0 : i32
    %c0_i32_0 = arith.constant 0 : i32
    return %arg0, %c0_i32 : i32, i32
  }
}

</mosaic_0001>

<bundles_post_ra>
// kernel: tpu_custom_call.1
= control target key start
LH: loop header
LB: loop body
LE: loop exit
PB: predicated region body
PF: predicated region fallthrough
CT: control target
= control target key end

     0   :  { %vm48_vm0 = vcmask 130048   ;;  %vm196_vm1 = vcmask 64512   ;;  %vm443_vm2 = vcmask 15360   ;;  %s823_s2 = inlined_call_operand.vmem [shape: f32[16,8], index: 2, kind: input, shape index: {}]   ;;  %s824_s0 = inlined_call_operand.vmem [shape: f32[128,16], index: 0, kind: input, shape index: {}]   ;;  %s825_s3 = inlined_call_operand.vmem [shape: f32[1,8], index: 3, kind: input, shape index: {}]   ;;  %s826_s4 = inlined_call_operand.vmem [shape: f32[8,2], index: 4, kind: input, shape index: {}]   ;;  %s827_s5 = inlined_call_operand.vmem [shape: f32[8,2], index: 5, kind: input, shape index: {}]   ;;  %s828_s1 = inlined_call_operand.vmem [shape: f32[128,8], index: 1, kind: input, shape index: {}]   ;;  %s829_s6 = inlined_call_operand.vmem [shape: f32[1,2], index: 6, kind: input, shape index: {}]   ;;  %s830_s7 = inlined_call_operand.vmem [shape: f32[128,2], index: 7, kind: output, shape index: {}]  }
   0x1   :  { %v43_v0 = vld [vmem:[%s823_s2 + $0x8] sm:$0xff]  ;;  %v42_v1 = vld [vmem:[%s823_s2] sm:$0xff]  ;;  %v28_v5 = vld [vmem:[%s824_s0 + $0x10] sm:$0xff] }
   0x2   :  { %111 = vmatpush.msra.mxu0 %v43_v0  ;;  %v26_v2 = vld [vmem:[%s824_s0] sm:$0xff]  ;;  %512 = vmatpush.msra.mxu3 %v43_v0  ;;  %v27_v3 = vld [vmem:[%s824_s0 + $0x8] sm:$0xff]  ;;  %v29_v7 = vld [vmem:[%s824_s0 + $0x18] sm:$0xff] }
   0x3   :  { %v38_v4 = vld [vmem:[%s824_s0 + $0x60] sm:$0xff]  ;;  %v39_v6 = vld [vmem:[%s824_s0 + $0x68] sm:$0xff]  ;;  %v40_v8 = vld [vmem:[%s824_s0 + $0x70] sm:$0xff] }
   0x4   :  { %112 = vmatpush.msra.mxu0 %v42_v1  ;;  %513 = vmatpush.msra.mxu3 %v42_v1  ;;  %v30_v9 = vld [vmem:[%s824_s0 + $0x20] sm:$0xff]  ;;  %v41_v10 = vld [vmem:[%s824_s0 + $0x78] sm:$0xff]  ;;  %v31_v11 = vld [vmem:[%s824_s0 + $0x28] sm:$0xff] }
   0x5   :  { %464 = vmatmul.msk.f32.vlgmr.msra.gmra.mxu0 %vm48_vm0, %v26_v2  ;;  %476 = vmatmul.msk.f32.vlgmr.msra.gmra.mxu3 %vm48_vm0, %v38_v4  ;;  %v32_v12 = vld [vmem:[%s824_s0 + $0x30] sm:$0xff]  ;;  %v33_v13 = vld [vmem:[%s824_s0 + $0x38] sm:$0xff]  ;;  %v34_v14 = vld [vmem:[%s824_s0 + $0x40] sm:$0xff] }
   0x6   :  { %v35_v15 = vld [vmem:[%s824_s0 + $0x48] sm:$0xff]  ;;  %v36_v16 = vld [vmem:[%s824_s0 + $0x50] sm:$0xff]  ;;  %v37_v17 = vld [vmem:[%s824_s0 + $0x58] sm:$0xff] }
   0x7   :  { %v178_v18 = vld [vmem:[%s826_s4] sm:$0xff]  ;;  %v180_v21 = vld [vmem:[%s828_s1 + $0x8] sm:$0xff]  ;;  %v181_v22 = vld [vmem:[%s828_s1 + $0x10] sm:$0xff] }
   0x8   :  { %373 = vmatpush.msra.mxu2 %v178_v18  ;;  %v195_v19 = vld [vmem:[%s827_s5] sm:$0xff]  ;;  %v182_v26 = vld [vmem:[%s828_s1 + $0x18] sm:$0xff]  ;;  %v192_v28 = vld [vmem:[%s828_s1 + $0x68] sm:$0xff] }
   0x9   :  { %260 = vmatpush.msra.mxu1 %v195_v19  ;;  %v179_v20 = vld [vmem:[%s828_s1] sm:$0xff]  ;;  %514 = vmatpush.msrb.mxu3 %v195_v19  ;;  %v193_v33 = vld [vmem:[%s828_s1 + $0x70] sm:$0xff]  ;;  %v184_v37 = vld [vmem:[%s828_s1 + $0x28] sm:$0xff] }
   0xa   :  { %480 = vmatmul.msk.f32.vlgmr.msra.gmra.mxu1 %vm196_vm1, %v179_v20  ;;  %v649_v23 = vld [vmem:[%s825_s3] ss:$0 sm:$0xff]  ;;  %v194_v39 = vld [vmem:[%s828_s1 + $0x78] sm:$0xff]  ;;  %v185_v44 = vld [vmem:[%s828_s1 + $0x30] sm:$0xff] }
   0xb   :  { %515 = vmatpush.msra.mxu3 %v178_v18  ;;  %v183_v31 = vld [vmem:[%s828_s1 + $0x20] sm:$0xff]  ;;  %v186_v51 = vld [vmem:[%s828_s1 + $0x38] sm:$0xff]  ;;  %v188_v63 = vld [vmem:[%s828_s1 + $0x48] sm:$0xff] }
   0xc   :  { %v187_v58 = vld [vmem:[%s828_s1 + $0x40] sm:$0xff] }
   0xd   :  { %465 = vmatmul.msk.f32.gmra.mxu0 %vm48_vm0, %v27_v3  ;;  %477 = vmatmul.msk.f32.gmra.mxu3 %vm48_vm0, %v39_v6  ;;  %v189_v3 = vld [vmem:[%s828_s1 + $0x50] sm:$0xff]  ;;  %v190_v6 = vld [vmem:[%s828_s1 + $0x58] sm:$0xff] }
  0x12   :  { %481 = vmatmul.msk.f32.gmra.mxu1 %vm196_vm1, %v180_v21 }
  0x15   :  { %466 = vmatmul.msk.f32.gmra.mxu0 %vm48_vm0, %v28_v5  ;;  %478 = vmatmul.msk.f32.gmra.mxu3 %vm48_vm0, %v40_v8 }
  0x1a   :  { %482 = vmatmul.msk.f32.gmra.mxu1 %vm196_vm1, %v181_v22 }
  0x1d   :  { %467 = vmatmul.msk.f32.gmra.mxu0 %vm48_vm0, %v29_v7  ;;  %479 = vmatmul.msk.f32.gmra.mxu3 %vm48_vm0, %v41_v10  ;;  %v191_v10 = vld [vmem:[%s828_s1 + $0x60] sm:$0xff] }
  0x22   :  { %483 = vmatmul.msk.f32.gmra.mxu1 %vm196_vm1, %v182_v26 }
  0x25   :  { %468 = vmatmul.msk.f32.gmra.mxu0 %vm48_vm0, %v30_v9  ;;  %493 = vmatmul.msk.f32.vlgmr.msrb.gmra.mxu3 %vm196_vm1, %v192_v28 }
  0x2a   :  { %484 = vmatmul.msk.f32.gmra.mxu1 %vm196_vm1, %v183_v31 }
  0x2d   :  { %469 = vmatmul.msk.f32.gmra.mxu0 %vm48_vm0, %v31_v11  ;;  %494 = vmatmul.msk.f32.gmra.mxu3 %vm196_vm1, %v193_v33 }
  0x32   :  { %485 = vmatmul.msk.f32.gmra.mxu1 %vm196_vm1, %v184_v37 }
  0x35   :  { %470 = vmatmul.msk.f32.gmra.mxu0 %vm48_vm0, %v32_v12  ;;  %495 = vmatmul.msk.f32.gmra.mxu3 %vm196_vm1, %v194_v39 }
  0x3a   :  { %486 = vmatmul.msk.f32.gmra.mxu1 %vm196_vm1, %v185_v44 }
  0x3d   :  { %471 = vmatmul.msk.f32.gmra.mxu0 %vm48_vm0, %v33_v13 }
  0x42   :  { %487 = vmatmul.msk.f32.gmra.mxu1 %vm196_vm1, %v186_v51 }
  0x45   :  { %472 = vmatmul.msk.f32.gmra.mxu0 %vm48_vm0, %v34_v14 }
  0x4a   :  { %488 = vmatmul.msk.f32.gmra.mxu1 %vm196_vm1, %v187_v58 }
  0x4d   :  { %473 = vmatmul.msk.f32.gmra.mxu0 %vm48_vm0, %v35_v15 }
  0x52   :  { %489 = vmatmul.msk.f32.gmra.mxu1 %vm196_vm1, %v188_v63 }
  0x55   :  { %474 = vmatmul.msk.f32.gmra.mxu0 %vm48_vm0, %v36_v16 }
  0x5a   :  { %490 = vmatmul.msk.f32.gmra.mxu1 %vm196_vm1, %v189_v3 }
  0x5d   :  { %475 = vmatmul.msk.f32.gmra.mxu0 %vm48_vm0, %v37_v17 }
  0x62   :  { %491 = vmatmul.msk.f32.gmra.mxu1 %vm196_vm1, %v190_v6 }
  0x6a   :  { %492 = vmatmul.msk.f32.gmra.mxu1 %vm196_vm1, %v191_v10 }
  0x82   :  { %v114_v24 = vpop.f32.mrf.mxu0 }
  0x83   :  { %v115_v25 = vadd.f32 %v649_v23, %v114_v24 }
  0x85   :  { %v162_v27 = vmax.f32 %v115_v25, 0.0  ;;  %v741_v25 = vld [vmem:[%s829_s6] ss:$0 sm:$0xff] }
  0x87   :  { %496 = vmatmul.msk.f32.vlgmr.msra.gmra.mxu2 %vm196_vm1, %v162_v27  ;;  %v262_v21 = vpop.f32.mrf.mxu1 }
  0x88   :  { %v671_v35 = vpop.f32.mrf.mxu3 }
  0x89   :  { %v151_v19 = vadd.f32 %v649_v23, %v671_v35 }
  0x8a   :  { %v117_v29 = vpop.f32.mrf.mxu0 }
  0x8b   :  { %v118_v30 = vadd.f32 %v649_v23, %v117_v29  ;;  %v174_v20 = vmax.f32 %v151_v19, 0.0 }
  0x8d   :  { %v163_v32 = vmax.f32 %v118_v30, 0.0 }
  0x8f   :  { %497 = vmatmul.msk.f32.gmra.mxu2 %vm196_vm1, %v163_v32  ;;  %v265_v22 = vpop.f32.mrf.mxu1 }
  0x90   :  { %v153_v41 = vpop.f32.mrf.mxu3 }
  0x91   :  { %v154_v43 = vadd.f32 %v649_v23, %v153_v41 }
  0x92   :  { %v120_v34 = vpop.f32.mrf.mxu0 }
  0x93   :  { %v121_v36 = vadd.f32 %v649_v23, %v120_v34  ;;  %v175_v46 = vmax.f32 %v154_v43, 0.0 }
  0x95   :  { %v164_v38 = vmax.f32 %v121_v36, 0.0  ;;  %509 = vmatmul.msk.f32.vlgmr.msra.gmra.mxu3 %vm196_vm1, %v175_v46 }
  0x97   :  { %498 = vmatmul.msk.f32.gmra.mxu2 %vm196_vm1, %v164_v38  ;;  %v268_v24 = vpop.f32.mrf.mxu1 }
  0x98   :  { %v156_v48 = vpop.f32.mrf.mxu3 }
  0x99   :  { %v157_v50 = vadd.f32 %v649_v23, %v156_v48 }
  0x9a   :  { %v123_v40 = vpop.f32.mrf.mxu0 }
  0x9b   :  { %v124_v42 = vadd.f32 %v649_v23, %v123_v40  ;;  %v176_v53 = vmax.f32 %v157_v50, 0.0 }
  0x9d   :  { %v165_v45 = vmax.f32 %v124_v42, 0.0  ;;  %510 = vmatmul.msk.f32.gmra.mxu3 %vm196_vm1, %v176_v53 }
  0x9f   :  { %499 = vmatmul.msk.f32.gmra.mxu2 %vm196_vm1, %v165_v45  ;;  %v271_v30 = vpop.f32.mrf.mxu1 }
  0xa0   :  { %v159_v55 = vpop.f32.mrf.mxu3 }
  0xa1   :  { %v160_v57 = vadd.f32 %v649_v23, %v159_v55 }
  0xa2   :  { %v126_v47 = vpop.f32.mrf.mxu0 }
  0xa3   :  { %v127_v49 = vadd.f32 %v649_v23, %v126_v47  ;;  %v177_v60 = vmax.f32 %v160_v57, 0.0 }
  0xa5   :  { %v166_v52 = vmax.f32 %v127_v49, 0.0  ;;  %511 = vmatmul.msk.f32.gmra.mxu3 %vm196_vm1, %v177_v60 }
  0xa7   :  { %500 = vmatmul.msk.f32.gmra.mxu2 %vm196_vm1, %v166_v52  ;;  %v274_v34 = vpop.f32.mrf.mxu1 }
  0xa8   :  { %v301_v26 = vpop.f32.mrf.mxu3 }
  0xaa   :  { %v129_v54 = vpop.f32.mrf.mxu0 }
  0xab   :  { %v130_v56 = vadd.f32 %v649_v23, %v129_v54 }
  0xad   :  { %v167_v59 = vmax.f32 %v130_v56, 0.0 }
  0xaf   :  { %501 = vmatmul.msk.f32.gmra.mxu2 %vm196_vm1, %v167_v59  ;;  %v277_v40 = vpop.f32.mrf.mxu1 }
  0xb2   :  { %v132_v61 = vpop.f32.mrf.mxu0 }
  0xb3   :  { %v133_v62 = vadd.f32 %v649_v23, %v132_v61 }
  0xb5   :  { %v168_v0 = vmax.f32 %v133_v62, 0.0 }
  0xb7   :  { %502 = vmatmul.msk.f32.gmra.mxu2 %vm196_vm1, %v168_v0  ;;  %v280_v49 = vpop.f32.mrf.mxu1 }
  0xba   :  { %v135_v1 = vpop.f32.mrf.mxu0 }
  0xbb   :  { %v136_v2 = vadd.f32 %v649_v23, %v135_v1 }
  0xbd   :  { %v169_v4 = vmax.f32 %v136_v2, 0.0 }
  0xbf   :  { %503 = vmatmul.msk.f32.gmra.mxu2 %vm196_vm1, %v169_v4  ;;  %v283_v58 = vpop.f32.mrf.mxu1 }
  0xc2   :  { %v138_v5 = vpop.f32.mrf.mxu0 }
  0xc3   :  { %v139_v7 = vadd.f32 %v649_v23, %v138_v5 }
  0xc5   :  { %v170_v8 = vmax.f32 %v139_v7, 0.0 }
  0xc7   :  { %504 = vmatmul.msk.f32.gmra.mxu2 %vm196_vm1, %v170_v8  ;;  %v286_v63 = vpop.f32.mrf.mxu1 }
  0xca   :  { %v141_v9 = vpop.f32.mrf.mxu0 }
  0xcb   :  { %v142_v11 = vadd.f32 %v649_v23, %v141_v9 }
  0xcd   :  { %v171_v12 = vmax.f32 %v142_v11, 0.0 }
  0xcf   :  { %505 = vmatmul.msk.f32.gmra.mxu2 %vm196_vm1, %v171_v12  ;;  %v289_v4 = vpop.f32.mrf.mxu1 }
  0xd2   :  { %v144_v13 = vpop.f32.mrf.mxu0 }
  0xd3   :  { %v145_v14 = vadd.f32 %v649_v23, %v144_v13 }
  0xd5   :  { %v172_v15 = vmax.f32 %v145_v14, 0.0 }
  0xd7   :  { %506 = vmatmul.msk.f32.gmra.mxu2 %vm196_vm1, %v172_v15  ;;  %v292_v9 = vpop.f32.mrf.mxu1 }
  0xda   :  { %v147_v16 = vpop.f32.mrf.mxu0 }
  0xdb   :  { %v148_v17 = vadd.f32 %v649_v23, %v147_v16  ;;  %v304_v23 = vpop.f32.mrf.mxu3 }
  0xdd   :  { %v173_v18 = vmax.f32 %v148_v17, 0.0 }
  0xdf   :  { %507 = vmatmul.msk.f32.gmra.mxu2 %vm196_vm1, %v173_v18  ;;  %v295_v14 = vpop.f32.mrf.mxu1 }
  0xe3   :  { %v307_v35 = vpop.f32.mrf.mxu3 }
  0xe7   :  { %508 = vmatmul.msk.f32.gmra.mxu2 %vm196_vm1, %v174_v20  ;;  %v298_v18 = vpop.f32.mrf.mxu1 }
 0x10a   :  { %v375_v27 = vpop.f32.mrf.mxu2 }
 0x10b   :  { %v376_v28 = vadd.f32 %v375_v27, %v262_v21 }
 0x10d   :  { %v427_v29 = vadd.f32 %v741_v25, %v376_v28 }
 0x10f   :  { %444 = vst.msk [vmem:[%s830_s7] sm:$0xff] %vm443_vm2, %v427_v29 }
 0x112   :  { %v378_v31 = vpop.f32.mrf.mxu2 }
 0x113   :  { %v379_v32 = vadd.f32 %v378_v31, %v265_v22 }
 0x115   :  { %v428_v33 = vadd.f32 %v741_v25, %v379_v32 }
 0x117   :  { %445 = vst.msk [vmem:[%s830_s7 + $0x8] sm:$0xff] %vm443_vm2, %v428_v33 }
 0x118   :  { %v414_v42 = vpop.f32.mrf.mxu3 }
 0x119   :  { %v415_v43 = vadd.f32 %v414_v42, %v301_v26 }
 0x11a   :  { %v381_v36 = vpop.f32.mrf.mxu2 }
 0x11b   :  { %v382_v37 = vadd.f32 %v381_v36, %v268_v24  ;;  %v440_v45 = vadd.f32 %v741_v25, %v415_v43 }
 0x11d   :  { %v429_v38 = vadd.f32 %v741_v25, %v382_v37  ;;  %457 = vst.msk [vmem:[%s830_s7 + $0x68] sm:$0xff] %vm443_vm2, %v440_v45 }
 0x11f   :  { %446 = vst.msk [vmem:[%s830_s7 + $0x10] sm:$0xff] %vm443_vm2, %v429_v38 }
 0x120   :  { %v417_v48 = vpop.f32.mrf.mxu3 }
 0x121   :  { %v418_v50 = vadd.f32 %v417_v48, %v304_v23 }
 0x122   :  { %v384_v39 = vpop.f32.mrf.mxu2 }
 0x123   :  { %v385_v41 = vadd.f32 %v384_v39, %v271_v30  ;;  %v441_v52 = vadd.f32 %v741_v25, %v418_v50 }
 0x125   :  { %v430_v44 = vadd.f32 %v741_v25, %v385_v41  ;;  %458 = vst.msk [vmem:[%s830_s7 + $0x70] sm:$0xff] %vm443_vm2, %v441_v52 }
 0x127   :  { %447 = vst.msk [vmem:[%s830_s7 + $0x18] sm:$0xff] %vm443_vm2, %v430_v44 }
 0x128   :  { %v420_v55 = vpop.f32.mrf.mxu3 }
 0x129   :  { %v421_v56 = vadd.f32 %v420_v55, %v307_v35 }
 0x12a   :  { %v387_v46 = vpop.f32.mrf.mxu2 }
 0x12b   :  { %v388_v47 = vadd.f32 %v387_v46, %v274_v34  ;;  %v442_v59 = vadd.f32 %v741_v25, %v421_v56 }
 0x12d   :  { %v431_v51 = vadd.f32 %v741_v25, %v388_v47  ;;  %459 = vst.msk [vmem:[%s830_s7 + $0x78] sm:$0xff] %vm443_vm2, %v442_v59 }
 0x12f   :  { %448 = vst.msk [vmem:[%s830_s7 + $0x20] sm:$0xff] %vm443_vm2, %v431_v51 }
 0x132   :  { %v390_v53 = vpop.f32.mrf.mxu2 }
 0x133   :  { %v391_v54 = vadd.f32 %v390_v53, %v277_v40 }
 0x135   :  { %v432_v57 = vadd.f32 %v741_v25, %v391_v54 }
 0x137   :  { %449 = vst.msk [vmem:[%s830_s7 + $0x28] sm:$0xff] %vm443_vm2, %v432_v57 }
 0x13a   :  { %v393_v60 = vpop.f32.mrf.mxu2 }
 0x13b   :  { %v394_v61 = vadd.f32 %v393_v60, %v280_v49 }
 0x13d   :  { %v433_v62 = vadd.f32 %v741_v25, %v394_v61 }
 0x13f   :  { %450 = vst.msk [vmem:[%s830_s7 + $0x30] sm:$0xff] %vm443_vm2, %v433_v62 }
 0x142   :  { %v396_v0 = vpop.f32.mrf.mxu2 }
 0x143   :  { %v397_v1 = vadd.f32 %v396_v0, %v283_v58 }
 0x145   :  { %v434_v2 = vadd.f32 %v741_v25, %v397_v1 }
 0x147   :  { %451 = vst.msk [vmem:[%s830_s7 + $0x38] sm:$0xff] %vm443_vm2, %v434_v2 }
 0x14a   :  { %v399_v3 = vpop.f32.mrf.mxu2 }
 0x14b   :  { %v400_v5 = vadd.f32 %v399_v3, %v286_v63 }
 0x14d   :  { %v435_v6 = vadd.f32 %v741_v25, %v400_v5 }
 0x14f   :  { %452 = vst.msk [vmem:[%s830_s7 + $0x40] sm:$0xff] %vm443_vm2, %v435_v6 }
 0x152   :  { %v402_v7 = vpop.f32.mrf.mxu2 }
 0x153   :  { %v403_v8 = vadd.f32 %v402_v7, %v289_v4 }
 0x155   :  { %v436_v10 = vadd.f32 %v741_v25, %v403_v8 }
 0x157   :  { %453 = vst.msk [vmem:[%s830_s7 + $0x48] sm:$0xff] %vm443_vm2, %v436_v10 }
 0x15a   :  { %v405_v11 = vpop.f32.mrf.mxu2 }
 0x15b   :  { %v406_v12 = vadd.f32 %v405_v11, %v292_v9 }
 0x15d   :  { %v437_v13 = vadd.f32 %v741_v25, %v406_v12 }
 0x15f   :  { %454 = vst.msk [vmem:[%s830_s7 + $0x50] sm:$0xff] %vm443_vm2, %v437_v13 }
 0x162   :  { %v408_v15 = vpop.f32.mrf.mxu2 }
 0x163   :  { %v409_v16 = vadd.f32 %v408_v15, %v295_v14 }
 0x165   :  { %v438_v17 = vadd.f32 %v741_v25, %v409_v16 }
 0x167   :  { %455 = vst.msk [vmem:[%s830_s7 + $0x58] sm:$0xff] %vm443_vm2, %v438_v17 }
 0x16a   :  { %v411_v19 = vpop.f32.mrf.mxu2 }
 0x16b   :  { %v412_v20 = vadd.f32 %v411_v19, %v298_v18 }
 0x16d   :  { %v439_v21 = vadd.f32 %v741_v25, %v412_v20 }
 0x16f   :  { %456 = vst.msk [vmem:[%s830_s7 + $0x60] sm:$0xff] %vm443_vm2, %v439_v21 }

</bundles_post_ra>
